<compile_context>
chip_gen: v7x
topology: tpu7x:2x2x1
jax: 0.10.0
libtpu: 0.0.40
codegen_flags: <defaults>
</compile_context>

<pallas_src>
import functools

import jax
import jax.numpy as jnp
from jax import lax
from jax.experimental import pallas as pl
from jax.experimental.pallas import tpu as pltpu

NUM_CLASSES = 10


def _vi_kernel(off_ref, px_ref, py_ref, lbl_ref, out_ref, *,
               tile_x, tile_y, grid_y):
    # off_ref            : SMEM i32[grid_x*grid_y + 1]  per-tile point ranges
    # px_ref/py_ref/lbl_ref : SMEM i32[N]   point data, bucketed by tile
    # out_ref            : VMEM f32[NUM_CLASSES, tile_x, tile_y]
    i = pl.program_id(0)
    j = pl.program_id(1)

    # Lane-dense zero-fill of the whole tile.  On v5e/v6e this hides under the
    # HBM writeback DMA; on v7x it is the in-kernel compute floor.
    out_ref[...] = jnp.zeros_like(out_ref)

    # Hoisted lane iota for the one-hot y indicator (built once per tile).
    y_iota = lax.broadcasted_iota(jnp.int32, (1, tile_y), 1)

    t = i * grid_y + j
    start = off_ref[t]
    stop = off_ref[t + 1]
    x_base = i * tile_x
    y_base = j * tile_y

    def point_body(n, carry):
        px_local = px_ref[n] - x_base        # scalar, in [0, tile_x)
        py_local = py_ref[n] - y_base        # scalar, in [0, tile_y)
        lbl = lbl_ref[n]                     # scalar, in [0, NUM_CLASSES)
        y_ind = y_iota == py_local           # (1, tile_y) one-hot indicator
        # Single-row read-modify-write: ~4 vregs each way instead of a plane.
        row = out_ref[lbl, pl.ds(px_local, 1), :]
        out_ref[lbl, pl.ds(px_local, 1), :] = jnp.where(y_ind, 1.0, row)
        return carry

    # Only this tile's points (dynamic trip count from the bucket offsets).
    lax.fori_loop(start, stop, point_body, 0)


def _pick_tiles(size):
    # Block dims must be (8,128)-divisible or equal the full array extent.
    # Full-extent single block for small sizes; 512-wide lane-dense blocks
    # otherwise (10,512,512 f32 ~= 10.5 MiB/buffer, ~21 MiB double-buffered).
    if size <= 512:
        return size, size
    return 512, 512


def visual_imitation_forward(z, labels, size, *, tile_x=None, tile_y=None,
                             channel_last=True):
    """Pallas equivalent of VisualImitation(size).forward(z, labels)."""
    n = z.shape[0]
    a = z[:, 0].astype(jnp.float32) * size
    b = z[:, 1].astype(jnp.float32) * size
    lbl = labels.reshape(n).astype(jnp.int32)

    px = jnp.floor(a).astype(jnp.int32)
    py = jnp.floor(b).astype(jnp.int32)

    # A point contributes iff both coords are strictly inside a unit cell of
    # the [0, size)^2 grid AND its label indexes a real class.  Everything
    # else has an all-zero mask / all-zero one-hot in the reference, i.e. no
    # contribution — route it to a dummy bucket the kernel never visits.
    valid = ((a > px.astype(jnp.float32)) & (b > py.astype(jnp.float32))
             & (px >= 0) & (px < size) & (py >= 0) & (py < size)
             & (lbl >= 0) & (lbl < NUM_CLASSES))

    dtx, dty = _pick_tiles(size)
    tile_x = dtx if tile_x is None else tile_x
    tile_y = dty if tile_y is None else tile_y
    assert tile_x == size or tile_x % 8 == 0, "tile_x must be full or 8-aligned"
    assert tile_y == size or tile_y % 128 == 0, "tile_y must be full or 128-aligned"
    grid_x = pl.cdiv(size, tile_x)
    grid_y = pl.cdiv(size, tile_y)
    num_tiles = grid_x * grid_y

    # Bucket points by destination tile (invalid points -> bucket num_tiles).
    tile_id = jnp.where(valid,
                        (px // tile_x) * grid_y + (py // tile_y),
                        num_tiles).astype(jnp.int32)
    order = jnp.argsort(tile_id)
    px_s = px[order]
    py_s = py[order]
    lbl_s = lbl[order]
    counts = jnp.bincount(tile_id, length=num_tiles + 1)
    offsets = jnp.concatenate(
        [jnp.zeros((1,), jnp.int32), jnp.cumsum(counts).astype(jnp.int32)]
    )[: num_tiles + 1]
    # Note: for very large N the three SMEM point arrays could exceed SMEM;
    # the bucketing above already makes per-tile slices contiguous, so they
    # could then be moved to pl.ANY + per-tile DMA without changing the kernel
    # structure.

    kernel = functools.partial(_vi_kernel, tile_x=tile_x, tile_y=tile_y,
                               grid_y=grid_y)

    out_cxy = pl.pallas_call(
        kernel,
        out_shape=jax.ShapeDtypeStruct((NUM_CLASSES, size, size), jnp.float32),
        grid=(grid_x, grid_y),
        in_specs=[pl.BlockSpec(memory_space=pltpu.MemorySpace.SMEM)] * 4,
        out_specs=pl.BlockSpec((NUM_CLASSES, tile_x, tile_y),
                               lambda i, j: (0, i, j)),
        compiler_params=pltpu.CompilerParams(
            dimension_semantics=("parallel", "parallel"),
            vmem_limit_bytes=32 << 20),   # big tile also fits on v5e defaults
    )(offsets, px_s, py_s, lbl_s)

    if channel_last:
        # PyTorch parity: (C, X, Y) -> (X, Y, C).  Kept outside the kernel: a
        # 10-wide lane dim in-kernel would force ~12.8x padded VMEM blocks and
        # masked stores.  Consumers that accept channel-first should pass
        # channel_last=False and skip this extra HBM pass.
        return jnp.transpose(out_cxy, (1, 2, 0))
    return out_cxy


def _reference(z, labels, size):
    """Pure-JAX transcription of the PyTorch forward (for verification)."""
    n = z.shape[0]
    a = (z[:, 0] * size).reshape(n, 1, 1)
    b = (z[:, 1] * size).reshape(n, 1, 1)
    gx = jnp.arange(size, dtype=jnp.float32)                    # last dim (j)
    gy = jnp.arange(size, dtype=jnp.float32).reshape(-1, 1)     # second dim (i)
    x_pos = jnp.maximum(a - gx, 0.0)
    y_pos = jnp.maximum(b - gy, 0.0)
    pos = jnp.maximum(x_pos * y_pos, 0.0)
    x_neg = jnp.maximum((gx + 1.0) - a, 0.0)
    y_neg = jnp.maximum((gy + 1.0) - b, 0.0)
    neg = jnp.maximum(x_neg * y_neg, 0.0)
    mask = (pos * neg > 0.0).astype(jnp.float32)                # [N, i, j]
    onehot = jax.nn.one_hot(labels.reshape(n), NUM_CLASSES, dtype=jnp.float32)
    i_single = mask[..., None] * onehot[:, None, None, :]       # [N, i, j, C]
    i_single = jnp.transpose(i_single, (0, 2, 1, 3))            # [N, x, y, C]
    return jnp.max(i_single, axis=0)


if __name__ == "__main__":
    key = jax.random.PRNGKey(0)

    # Cases exercise: single full-extent block; 2x2 grid with even blocks +
    # cross-tile bucketing; 2x2 grid with partial boundary blocks.
    cases = [
        dict(size=200, n=8, tiles=None),
        dict(size=256, n=40, tiles=(128, 128)),
        dict(size=200, n=40, tiles=(128, 128)),
    ]
    for idx, case in enumerate(cases):
        size, n_pts, tiles = case["size"], case["n"], case["tiles"]
        kz, kl = jax.random.split(jax.random.fold_in(key, idx))
        z = jax.random.uniform(kz, (n_pts, 2), dtype=jnp.float32)
        labels = jax.random.randint(kl, (n_pts, 1), 0, NUM_CLASSES,
                                    dtype=jnp.int32)
        if idx == 0:
            # Integer-valued coordinate (0.5 * 200 == 100.0): must light nothing.
            z = z.at[0, 0].set(0.5)

        tx = None if tiles is None else tiles[0]
        ty = None if tiles is None else tiles[1]
        out = jax.block_until_ready(
            visual_imitation_forward(z, labels, size, tile_x=tx, tile_y=ty))
        ref = _reference(z, labels, size)

        assert out.shape == (size, size, NUM_CLASSES)
        assert out.dtype == jnp.float32
        assert bool(jnp.array_equal(out, ref)), (
            f"mismatch vs reference (size={size}, tiles={tiles})")

    print("KERNEL_OK")
</pallas_src>

<mosaic_0001>
module attributes {stable_mosaic.version = 11 : i64} {
  func.func @_vi_kernel(%arg0: i32, %arg1: i32, %arg2: memref<2xi32, #tpu.memory_space<smem>>, %arg3: memref<8xi32, #tpu.memory_space<smem>>, %arg4: memref<8xi32, #tpu.memory_space<smem>>, %arg5: memref<8xi32, #tpu.memory_space<smem>>, %arg6: memref<10x200x200xf32, #tpu.memory_space<vmem>>) attributes {dimension_semantics = [#tpu.dimension_semantics<parallel>, #tpu.dimension_semantics<parallel>], iteration_bounds = array<i64: 1, 1>, scalar_prefetch = 0 : i64, scratch_operands = 0 : i64, tpu.core_type = #tpu.core_type<tc>, window_params = [{transform_indices = @transform_0, window_bounds = array<i64: 2>}, {transform_indices = @transform_1, window_bounds = array<i64: 8>}, {transform_indices = @transform_2, window_bounds = array<i64: 8>}, {transform_indices = @transform_3, window_bounds = array<i64: 8>}, {transform_indices = @transform_4, window_bounds = array<i64: 10, 200, 200>}]} {
    %cst = arith.constant 0.000000e+00 : f32
    %0 = vector.broadcast %cst : f32 to vector<10x200x200xf32>
    %c0 = arith.constant 0 : index
    %c0_0 = arith.constant 0 : index
    %c0_1 = arith.constant 0 : index
    %1 = vector.load %arg6[%c0, %c0_0, %c0_1] : memref<10x200x200xf32, #tpu.memory_space<vmem>>, vector<10x200x200xf32>
    tpu.vector_store %arg6[%c0, %c0_0, %c0_1], %0 {strides = array<i32>} : memref<10x200x200xf32, #tpu.memory_space<vmem>>, vector<10x200x200xf32>,
    %2 = tpu.iota {dimensions = array<i32: 1>} : vector<1x200xi32>
    %c1_i32 = arith.constant 1 : i32
    %3 = arith.muli %arg0, %c1_i32 : i32
    %4 = arith.addi %3, %arg1 : i32
    %5 = arith.index_cast %4 : i32 to index
    %6 = memref.load %arg2[%5] : memref<2xi32, #tpu.memory_space<smem>>
    %c1_i32_2 = arith.constant 1 : i32
    %7 = arith.addi %4, %c1_i32_2 : i32
    %8 = arith.index_cast %7 : i32 to index
    %9 = memref.load %arg2[%8] : memref<2xi32, #tpu.memory_space<smem>>
    %c200_i32 = arith.constant 200 : i32
    %10 = arith.muli %arg0, %c200_i32 : i32
    %c200_i32_3 = arith.constant 200 : i32
    %11 = arith.muli %arg1, %c200_i32_3 : i32
    %c0_i32 = arith.constant 0 : i32
    %12 = arith.subi %9, %6 : i32
    %13 = arith.addi %6, %12 : i32
    %c1_i32_4 = arith.constant 1 : i32
    scf.for %arg7 = %6 to %13 step %c1_i32_4  : i32 {
      %14 = arith.index_cast %arg7 : i32 to index
      %15 = memref.load %arg3[%14] : memref<8xi32, #tpu.memory_space<smem>>
      %16 = arith.subi %15, %10 : i32
      %17 = arith.index_cast %arg7 : i32 to index
      %18 = memref.load %arg4[%17] : memref<8xi32, #tpu.memory_space<smem>>
      %19 = arith.subi %18, %11 : i32
      %20 = arith.index_cast %arg7 : i32 to index
      %21 = memref.load %arg5[%20] : memref<8xi32, #tpu.memory_space<smem>>
      %22 = vector.broadcast %19 : i32 to vector<1x200xi32>
      %23 = arith.cmpi eq, %2, %22 : vector<1x200xi32>
      %24 = arith.index_cast %21 : i32 to index
      %25 = arith.index_cast %16 : i32 to index
      %c0_5 = arith.constant 0 : index
      %26 = vector.load %arg6[%24, %25, %c0_5] : memref<10x200x200xf32, #tpu.memory_space<vmem>>, vector<1x1x200xf32>
      %27 = vector.shape_cast %26 : vector<1x1x200xf32> to vector<1x200xf32>
      %cst_6 = arith.constant 1.000000e+00 : f32
      %28 = vector.broadcast %cst_6 : f32 to vector<1x200xf32>
      %29 = arith.select %23, %28, %27 : vector<1x200xi1>, vector<1x200xf32>
      %30 = arith.index_cast %21 : i32 to index
      %31 = arith.index_cast %16 : i32 to index
      %c0_7 = arith.constant 0 : index
      %32 = vector.load %arg6[%30, %31, %c0_7] : memref<10x200x200xf32, #tpu.memory_space<vmem>>, vector<1x1x200xf32>
      %33 = vector.shape_cast %32 : vector<1x1x200xf32> to vector<1x200xf32>
      %34 = vector.shape_cast %29 : vector<1x200xf32> to vector<1x1x200xf32>
      tpu.vector_store %arg6[%30, %31, %c0_7], %34 {strides = array<i32>} : memref<10x200x200xf32, #tpu.memory_space<vmem>>, vector<1x1x200xf32>,
    }
    return
  }
  func.func @transform_0(%arg0: i32, %arg1: i32) -> i32 {
    %c0_i32 = arith.constant 0 : i32
    %c0_i32_0 = arith.constant 0 : i32
    return %c0_i32 : i32
  }
  func.func @transform_1(%arg0: i32, %arg1: i32) -> i32 {
    %c0_i32 = arith.constant 0 : i32
    %c0_i32_0 = arith.constant 0 : i32
    return %c0_i32 : i32
  }
  func.func @transform_2(%arg0: i32, %arg1: i32) -> i32 {
    %c0_i32 = arith.constant 0 : i32
    %c0_i32_0 = arith.constant 0 : i32
    return %c0_i32 : i32
  }
  func.func @transform_3(%arg0: i32, %arg1: i32) -> i32 {
    %c0_i32 = arith.constant 0 : i32
    %c0_i32_0 = arith.constant 0 : i32
    return %c0_i32 : i32
  }
  func.func @transform_4(%arg0: i32, %arg1: i32) -> (i32, i32, i32) {
    %c0_i32 = arith.constant 0 : i32
    %c0_i32_0 = arith.constant 0 : i32
    return %c0_i32, %arg0, %arg1 : i32, i32, i32
  }
}

</mosaic_0001>

<bundles_post_ra>
// kernel: tpu_custom_call.1
= control target key start
LH: loop header
LB: loop body
LE: loop exit
PB: predicated region body
PF: predicated region fallthrough
CT: control target
= control target key end

     0   :  { %9 = vsyncpa [#allocation4], 0  ;;  %s1624_s0 = inlined_call_operand.hbm [shape: s32[2], index: 0, kind: input, shape index: {}]   ;;  %s1625_s1 = inlined_call_operand.hbm [shape: s32[8], index: 1, kind: input, shape index: {}]   ;;  %s1626_s2 = inlined_call_operand.hbm [shape: s32[8], index: 2, kind: input, shape index: {}]   ;;  %s1627_s3 = inlined_call_operand.hbm [shape: s32[8], index: 3, kind: input, shape index: {}]   ;;  %s1628_s4 = inlined_call_operand.hbm [shape: f32[10,200,200], index: 4, kind: output, shape index: {}]  }
   0x1   :  { %10 = vsyncpa [#allocation6], 0 }
   0x2   :  { %11 = vsyncpa [#allocation9], 0 }
   0x3   :  { %12 = vsyncpa [#allocation3], 0  ;;  %s680_s17 = scalar_lea.hbm %s1625_s1, 16 }
   0x4   :  { %p681_p0 = scmp.ne.s32.totalorder %s1625_s1, %s680_s17  ;;  %p684_p1 = scmp.lt.u32.totalorder %s680_s17, %s1625_s1 }
   0x6   :  { %p686_p2 = pnand %p684_p1, %p681_p0 }
   0x8   :  { %689 = shalt.err (!%p686_p2)
}
   0x9   :  { %s758_s22 = smov [#allocation5]   ;;  %s690_s27 = scalar_lea.hbm %s1624_s0, 16 }
   0xa   :  { %28 = dma.hbm_to_smem %s1625_s1, 16, %s758_s22, [#allocation6]  }
   0xb   :  { %p691_p3 = scmp.ne.s32.totalorder %s1624_s0, %s690_s27  ;;  %p694_p4 = scmp.lt.u32.totalorder %s690_s27, %s1624_s0 }
   0xd   :  { %p696_p5 = pnand %p694_p4, %p691_p3 }
   0xf   :  { %699 = shalt.err (!%p696_p5)
}
  0x10   :  { %s759_s6 = smov [#allocation2]   ;;  %s700_s10 = scalar_lea.hbm %s1626_s2, 16 }
  0x11   :  { %20 = dma.hbm_to_smem %s1624_s0, 16, %s759_s6, [#allocation4]  }
  0x12   :  { %p701_p6 = scmp.ne.s32.totalorder %s1626_s2, %s700_s10  ;;  %p704_p7 = scmp.lt.u32.totalorder %s700_s10, %s1626_s2 }
  0x14   :  { %p706_p8 = pnand %p704_p7, %p701_p6 }
  0x16   :  { %709 = shalt.err (!%p706_p8)
}
  0x17   :  { %s760_s15 = smov [#allocation7]   ;;  %s710_s19 = scalar_lea.hbm %s1627_s3, 16 }
  0x18   :  { %36 = dma.hbm_to_smem %s1626_s2, 16, %s760_s15, [#allocation6]  }
  0x19   :  { %p711_p9 = scmp.ne.s32.totalorder %s1627_s3, %s710_s19  ;;  %p714_p10 = scmp.lt.u32.totalorder %s710_s19, %s1627_s3 }
  0x1b   :  { %p716_p11 = pnand %p714_p10, %p711_p9 }
  0x1d   :  { %719 = shalt.err (!%p716_p11)
}
  0x1e   :  { %s761_s24 = smov [#allocation8]  }
  0x1f   :  { %44 = dma.hbm_to_smem %s1627_s3, 16, %s761_s24, [#allocation9]  }
  0x20   :  { %746 = dma.done.wait [#allocation4], 16  }
  0x21   :  { %747 = vsyncadd [#allocation4], 4294967280 }
  0x22   :  { %748 = dma.done.wait [#allocation6], 32  }
  0x23   :  { %749 = vsyncadd [#allocation6], 4294967264 }
  0x24   :  { %750 = dma.done.wait [#allocation9], 16  }
  0x25   :  { %751 = vsyncadd [#allocation9], 4294967280 }
  0x26   :  { %57 = sfence }
  0x27   :  { %vm59_vm0 = vcmask 588800   ;;  %v559_v0 = vlaneseq  ;;  %s840_s2 = sld [smem:[#allocation2]]   ;;  %s842_s27 = sld [smem:[#allocation2 + $0x1]]  ;;  %v762_v1 = vmov 0.0  }
  0x28   :  { %58 = vst [vmem:[#allocation10] sm:$0xff] %v762_v1  ;;  %61 = vst [vmem:[#allocation10 + $0x10] sm:$0xff] %v762_v1 }
  0x29   :  { %63 = vst [vmem:[#allocation10 + $0x20] sm:$0xff] %v762_v1  ;;  %65 = vst [vmem:[#allocation10 + $0x30] sm:$0xff] %v762_v1  ;;  %v560_v2 = vand.u32 127, %v559_v0 }
  0x2a   :  { %67 = vst [vmem:[#allocation10 + $0x40] sm:$0xff] %v762_v1  ;;  %69 = vst [vmem:[#allocation10 + $0x50] sm:$0xff] %v762_v1 }
  0x2b   :  { %71 = vst [vmem:[#allocation10 + $0x60] sm:$0xff] %v762_v1  ;;  %73 = vst [vmem:[#allocation10 + $0x70] sm:$0xff] %v762_v1  ;;  %v561_v3 = vadd.s32 128, %v560_v2 }
  0x2c   :  { %75 = vst [vmem:[#allocation10 + $0x80] sm:$0xff] %v762_v1  ;;  %77 = vst [vmem:[#allocation10 + $0x90] sm:$0xff] %v762_v1 }
  0x2d   :  { %79 = vst [vmem:[#allocation10 + $0xa0] sm:$0xff] %v762_v1  ;;  %81 = vst [vmem:[#allocation10 + $0xb0] sm:$0xff] %v762_v1  ;;  %p655_p12 = scmp.ge.s32.totalorder %s840_s2, %s842_s27 }
  0x2e   :  { %83 = vst [vmem:[#allocation10 + $0xc0] sm:$0xff] %v762_v1  ;;  %85 = vst [vmem:[#allocation10 + $0xd0] sm:$0xff] %v762_v1 }
  0x2f   :  { %87 = vst [vmem:[#allocation10 + $0xe0] sm:$0xff] %v762_v1  ;;  %89 = vst [vmem:[#allocation10 + $0xf0] sm:$0xff] %v762_v1 }
  0x30   :  { %91 = vst [vmem:[#allocation10 + $0x100] sm:$0xff] %v762_v1  ;;  %93 = vst [vmem:[#allocation10 + $0x110] sm:$0xff] %v762_v1 }
  0x31   :  { %95 = vst [vmem:[#allocation10 + $0x120] sm:$0xff] %v762_v1  ;;  %97 = vst [vmem:[#allocation10 + $0x130] sm:$0xff] %v762_v1 }
  0x32   :  { %99 = vst [vmem:[#allocation10 + $0x140] sm:$0xff] %v762_v1  ;;  %101 = vst [vmem:[#allocation10 + $0x150] sm:$0xff] %v762_v1 }
  0x33   :  { %103 = vst [vmem:[#allocation10 + $0x160] sm:$0xff] %v762_v1  ;;  %105 = vst [vmem:[#allocation10 + $0x170] sm:$0xff] %v762_v1 }
  0x34   :  { %107 = vst [vmem:[#allocation10 + $0x180] sm:$0xff] %v762_v1  ;;  %109 = vst [vmem:[#allocation10 + $0x190] sm:$0xff] %v762_v1 }
  0x35   :  { %111 = vst [vmem:[#allocation10 + $0x1a0] sm:$0xff] %v762_v1  ;;  %113 = vst [vmem:[#allocation10 + $0x1b0] sm:$0xff] %v762_v1 }
  0x36   :  { %115 = vst [vmem:[#allocation10 + $0x1c0] sm:$0xff] %v762_v1  ;;  %117 = vst [vmem:[#allocation10 + $0x1d0] sm:$0xff] %v762_v1 }
  0x37   :  { %119 = vst [vmem:[#allocation10 + $0x1e0] sm:$0xff] %v762_v1  ;;  %121 = vst [vmem:[#allocation10 + $0x1f0] sm:$0xff] %v762_v1 }
  0x38   :  { %123 = vst [vmem:[#allocation10 + $0x200] sm:$0xff] %v762_v1  ;;  %125 = vst [vmem:[#allocation10 + $0x210] sm:$0xff] %v762_v1 }
  0x39   :  { %127 = vst [vmem:[#allocation10 + $0x220] sm:$0xff] %v762_v1  ;;  %129 = vst [vmem:[#allocation10 + $0x230] sm:$0xff] %v762_v1 }
  0x3a   :  { %131 = vst [vmem:[#allocation10 + $0x240] sm:$0xff] %v762_v1  ;;  %133 = vst [vmem:[#allocation10 + $0x250] sm:$0xff] %v762_v1 }
  0x3b   :  { %135 = vst [vmem:[#allocation10 + $0x260] sm:$0xff] %v762_v1  ;;  %137 = vst [vmem:[#allocation10 + $0x270] sm:$0xff] %v762_v1 }
  0x3c   :  { %139 = vst [vmem:[#allocation10 + $0x280] sm:$0xff] %v762_v1  ;;  %141 = vst [vmem:[#allocation10 + $0x290] sm:$0xff] %v762_v1 }
  0x3d   :  { %143 = vst [vmem:[#allocation10 + $0x2a0] sm:$0xff] %v762_v1  ;;  %145 = vst [vmem:[#allocation10 + $0x2b0] sm:$0xff] %v762_v1 }
  0x3e   :  { %147 = vst [vmem:[#allocation10 + $0x2c0] sm:$0xff] %v762_v1  ;;  %149 = vst [vmem:[#allocation10 + $0x2d0] sm:$0xff] %v762_v1 }
  0x3f   :  { %151 = vst [vmem:[#allocation10 + $0x2e0] sm:$0xff] %v762_v1  ;;  %153 = vst [vmem:[#allocation10 + $0x2f0] sm:$0xff] %v762_v1 }
  0x40   :  { %155 = vst [vmem:[#allocation10 + $0x300] sm:$0xff] %v762_v1  ;;  %157 = vst [vmem:[#allocation10 + $0x310] sm:$0xff] %v762_v1 }
  0x41   :  { %159 = vst [vmem:[#allocation10 + $0x320] sm:$0xff] %v762_v1  ;;  %161 = vst [vmem:[#allocation10 + $0x330] sm:$0xff] %v762_v1 }
  0x42   :  { %163 = vst [vmem:[#allocation10 + $0x340] sm:$0xff] %v762_v1  ;;  %165 = vst [vmem:[#allocation10 + $0x350] sm:$0xff] %v762_v1 }
  0x43   :  { %167 = vst [vmem:[#allocation10 + $0x360] sm:$0xff] %v762_v1  ;;  %169 = vst [vmem:[#allocation10 + $0x370] sm:$0xff] %v762_v1 }
  0x44   :  { %171 = vst [vmem:[#allocation10 + $0x380] sm:$0xff] %v762_v1  ;;  %173 = vst [vmem:[#allocation10 + $0x390] sm:$0xff] %v762_v1 }
  0x45   :  { %175 = vst [vmem:[#allocation10 + $0x3a0] sm:$0xff] %v762_v1  ;;  %177 = vst [vmem:[#allocation10 + $0x3b0] sm:$0xff] %v762_v1 }
  0x46   :  { %179 = vst [vmem:[#allocation10 + $0x3c0] sm:$0xff] %v762_v1  ;;  %181 = vst [vmem:[#allocation10 + $0x3d0] sm:$0xff] %v762_v1 }
  0x47   :  { %183 = vst [vmem:[#allocation10 + $0x3e0] sm:$0xff] %v762_v1  ;;  %185 = vst [vmem:[#allocation10 + $0x3f0] sm:$0xff] %v762_v1 }
  0x48   :  { %187 = vst [vmem:[#allocation10 + $0x400] sm:$0xff] %v762_v1  ;;  %189 = vst [vmem:[#allocation10 + $0x410] sm:$0xff] %v762_v1 }
  0x49   :  { %191 = vst [vmem:[#allocation10 + $0x420] sm:$0xff] %v762_v1  ;;  %193 = vst [vmem:[#allocation10 + $0x430] sm:$0xff] %v762_v1 }
  0x4a   :  { %195 = vst [vmem:[#allocation10 + $0x440] sm:$0xff] %v762_v1  ;;  %197 = vst [vmem:[#allocation10 + $0x450] sm:$0xff] %v762_v1 }
  0x4b   :  { %199 = vst [vmem:[#allocation10 + $0x460] sm:$0xff] %v762_v1  ;;  %201 = vst [vmem:[#allocation10 + $0x470] sm:$0xff] %v762_v1 }
  0x4c   :  { %203 = vst [vmem:[#allocation10 + $0x480] sm:$0xff] %v762_v1  ;;  %205 = vst [vmem:[#allocation10 + $0x490] sm:$0xff] %v762_v1 }
  0x4d   :  { %207 = vst [vmem:[#allocation10 + $0x4a0] sm:$0xff] %v762_v1  ;;  %209 = vst [vmem:[#allocation10 + $0x4b0] sm:$0xff] %v762_v1 }
  0x4e   :  { %211 = vst [vmem:[#allocation10 + $0x4c0] sm:$0xff] %v762_v1  ;;  %213 = vst [vmem:[#allocation10 + $0x4d0] sm:$0xff] %v762_v1 }
  0x4f   :  { %215 = vst [vmem:[#allocation10 + $0x4e0] sm:$0xff] %v762_v1  ;;  %217 = vst [vmem:[#allocation10 + $0x4f0] sm:$0xff] %v762_v1 }
  0x50   :  { %219 = vst [vmem:[#allocation10 + $0x500] sm:$0xff] %v762_v1  ;;  %221 = vst [vmem:[#allocation10 + $0x510] sm:$0xff] %v762_v1 }
  0x51   :  { %223 = vst [vmem:[#allocation10 + $0x520] sm:$0xff] %v762_v1  ;;  %225 = vst [vmem:[#allocation10 + $0x530] sm:$0xff] %v762_v1 }
  0x52   :  { %227 = vst [vmem:[#allocation10 + $0x540] sm:$0xff] %v762_v1  ;;  %229 = vst [vmem:[#allocation10 + $0x550] sm:$0xff] %v762_v1 }
  0x53   :  { %231 = vst [vmem:[#allocation10 + $0x560] sm:$0xff] %v762_v1  ;;  %233 = vst [vmem:[#allocation10 + $0x570] sm:$0xff] %v762_v1 }
  0x54   :  { %235 = vst [vmem:[#allocation10 + $0x580] sm:$0xff] %v762_v1  ;;  %237 = vst [vmem:[#allocation10 + $0x590] sm:$0xff] %v762_v1 }
  0x55   :  { %239 = vst [vmem:[#allocation10 + $0x5a0] sm:$0xff] %v762_v1  ;;  %241 = vst [vmem:[#allocation10 + $0x5b0] sm:$0xff] %v762_v1 }
  0x56   :  { %243 = vst [vmem:[#allocation10 + $0x5c0] sm:$0xff] %v762_v1  ;;  %245 = vst [vmem:[#allocation10 + $0x5d0] sm:$0xff] %v762_v1 }
  0x57   :  { %247 = vst [vmem:[#allocation10 + $0x5e0] sm:$0xff] %v762_v1  ;;  %249 = vst [vmem:[#allocation10 + $0x5f0] sm:$0xff] %v762_v1 }
  0x58   :  { %251 = vst [vmem:[#allocation10 + $0x600] sm:$0xff] %v762_v1  ;;  %253 = vst [vmem:[#allocation10 + $0x610] sm:$0xff] %v762_v1 }
  0x59   :  { %255 = vst [vmem:[#allocation10 + $0x620] sm:$0xff] %v762_v1  ;;  %257 = vst [vmem:[#allocation10 + $0x630] sm:$0xff] %v762_v1 }
  0x5a   :  { %259 = vst [vmem:[#allocation10 + $0x640] sm:$0xff] %v762_v1  ;;  %261 = vst [vmem:[#allocation10 + $0x650] sm:$0xff] %v762_v1 }
  0x5b   :  { %263 = vst [vmem:[#allocation10 + $0x660] sm:$0xff] %v762_v1  ;;  %265 = vst [vmem:[#allocation10 + $0x670] sm:$0xff] %v762_v1 }
  0x5c   :  { %267 = vst [vmem:[#allocation10 + $0x680] sm:$0xff] %v762_v1  ;;  %269 = vst [vmem:[#allocation10 + $0x690] sm:$0xff] %v762_v1 }
  0x5d   :  { %271 = vst [vmem:[#allocation10 + $0x6a0] sm:$0xff] %v762_v1  ;;  %273 = vst [vmem:[#allocation10 + $0x6b0] sm:$0xff] %v762_v1 }
  0x5e   :  { %275 = vst [vmem:[#allocation10 + $0x6c0] sm:$0xff] %v762_v1  ;;  %277 = vst [vmem:[#allocation10 + $0x6d0] sm:$0xff] %v762_v1 }
  0x5f   :  { %279 = vst [vmem:[#allocation10 + $0x6e0] sm:$0xff] %v762_v1  ;;  %281 = vst [vmem:[#allocation10 + $0x6f0] sm:$0xff] %v762_v1 }
  0x60   :  { %283 = vst [vmem:[#allocation10 + $0x700] sm:$0xff] %v762_v1  ;;  %285 = vst [vmem:[#allocation10 + $0x710] sm:$0xff] %v762_v1 }
  0x61   :  { %287 = vst [vmem:[#allocation10 + $0x720] sm:$0xff] %v762_v1  ;;  %289 = vst [vmem:[#allocation10 + $0x730] sm:$0xff] %v762_v1 }
  0x62   :  { %291 = vst [vmem:[#allocation10 + $0x740] sm:$0xff] %v762_v1  ;;  %293 = vst [vmem:[#allocation10 + $0x750] sm:$0xff] %v762_v1 }
  0x63   :  { %295 = vst [vmem:[#allocation10 + $0x760] sm:$0xff] %v762_v1  ;;  %297 = vst [vmem:[#allocation10 + $0x770] sm:$0xff] %v762_v1 }
  0x64   :  { %299 = vst [vmem:[#allocation10 + $0x780] sm:$0xff] %v762_v1  ;;  %301 = vst [vmem:[#allocation10 + $0x790] sm:$0xff] %v762_v1 }
  0x65   :  { %303 = vst [vmem:[#allocation10 + $0x7a0] sm:$0xff] %v762_v1  ;;  %305 = vst [vmem:[#allocation10 + $0x7b0] sm:$0xff] %v762_v1 }
  0x66   :  { %307 = vst [vmem:[#allocation10 + $0x7c0] sm:$0xff] %v762_v1  ;;  %309 = vst [vmem:[#allocation10 + $0x7d0] sm:$0xff] %v762_v1 }
  0x67   :  { %311 = vst [vmem:[#allocation10 + $0x7e0] sm:$0xff] %v762_v1  ;;  %313 = vst [vmem:[#allocation10 + $0x7f0] sm:$0xff] %v762_v1 }
  0x68   :  { %315 = vst [vmem:[#allocation10 + $0x800] sm:$0xff] %v762_v1  ;;  %317 = vst [vmem:[#allocation10 + $0x810] sm:$0xff] %v762_v1 }
  0x69   :  { %319 = vst [vmem:[#allocation10 + $0x820] sm:$0xff] %v762_v1  ;;  %321 = vst [vmem:[#allocation10 + $0x830] sm:$0xff] %v762_v1 }
  0x6a   :  { %323 = vst [vmem:[#allocation10 + $0x840] sm:$0xff] %v762_v1  ;;  %325 = vst [vmem:[#allocation10 + $0x850] sm:$0xff] %v762_v1 }
  0x6b   :  { %327 = vst [vmem:[#allocation10 + $0x860] sm:$0xff] %v762_v1  ;;  %329 = vst [vmem:[#allocation10 + $0x870] sm:$0xff] %v762_v1 }
  0x6c   :  { %331 = vst [vmem:[#allocation10 + $0x880] sm:$0xff] %v762_v1  ;;  %333 = vst [vmem:[#allocation10 + $0x890] sm:$0xff] %v762_v1 }
  0x6d   :  { %335 = vst [vmem:[#allocation10 + $0x8a0] sm:$0xff] %v762_v1  ;;  %337 = vst [vmem:[#allocation10 + $0x8b0] sm:$0xff] %v762_v1 }
  0x6e   :  { %339 = vst [vmem:[#allocation10 + $0x8c0] sm:$0xff] %v762_v1  ;;  %341 = vst [vmem:[#allocation10 + $0x8d0] sm:$0xff] %v762_v1 }
  0x6f   :  { %343 = vst [vmem:[#allocation10 + $0x8e0] sm:$0xff] %v762_v1  ;;  %345 = vst [vmem:[#allocation10 + $0x8f0] sm:$0xff] %v762_v1 }
  0x70   :  { %347 = vst [vmem:[#allocation10 + $0x900] sm:$0xff] %v762_v1  ;;  %349 = vst [vmem:[#allocation10 + $0x910] sm:$0xff] %v762_v1 }
  0x71   :  { %351 = vst [vmem:[#allocation10 + $0x920] sm:$0xff] %v762_v1  ;;  %353 = vst [vmem:[#allocation10 + $0x930] sm:$0xff] %v762_v1 }
  0x72   :  { %355 = vst [vmem:[#allocation10 + $0x940] sm:$0xff] %v762_v1  ;;  %357 = vst [vmem:[#allocation10 + $0x950] sm:$0xff] %v762_v1 }
  0x73   :  { %359 = vst [vmem:[#allocation10 + $0x960] sm:$0xff] %v762_v1  ;;  %361 = vst [vmem:[#allocation10 + $0x970] sm:$0xff] %v762_v1 }
  0x74   :  { %363 = vst [vmem:[#allocation10 + $0x980] sm:$0xff] %v762_v1  ;;  %365 = vst [vmem:[#allocation10 + $0x990] sm:$0xff] %v762_v1 }
  0x75   :  { %367 = vst [vmem:[#allocation10 + $0x9a0] sm:$0xff] %v762_v1  ;;  %369 = vst [vmem:[#allocation10 + $0x9b0] sm:$0xff] %v762_v1 }
  0x76   :  { %371 = vst [vmem:[#allocation10 + $0x9c0] sm:$0xff] %v762_v1  ;;  %373 = vst [vmem:[#allocation10 + $0x9d0] sm:$0xff] %v762_v1 }
  0x77   :  { %375 = vst [vmem:[#allocation10 + $0x9e0] sm:$0xff] %v762_v1  ;;  %377 = vst [vmem:[#allocation10 + $0x9f0] sm:$0xff] %v762_v1 }
  0x78   :  { %379 = vst [vmem:[#allocation10 + $0xa00] sm:$0xff] %v762_v1  ;;  %381 = vst [vmem:[#allocation10 + $0xa10] sm:$0xff] %v762_v1 }
  0x79   :  { %383 = vst [vmem:[#allocation10 + $0xa20] sm:$0xff] %v762_v1  ;;  %385 = vst [vmem:[#allocation10 + $0xa30] sm:$0xff] %v762_v1 }
  0x7a   :  { %387 = vst [vmem:[#allocation10 + $0xa40] sm:$0xff] %v762_v1  ;;  %389 = vst [vmem:[#allocation10 + $0xa50] sm:$0xff] %v762_v1 }
  0x7b   :  { %391 = vst [vmem:[#allocation10 + $0xa60] sm:$0xff] %v762_v1  ;;  %393 = vst [vmem:[#allocation10 + $0xa70] sm:$0xff] %v762_v1 }
  0x7c   :  { %395 = vst [vmem:[#allocation10 + $0xa80] sm:$0xff] %v762_v1  ;;  %397 = vst [vmem:[#allocation10 + $0xa90] sm:$0xff] %v762_v1 }
  0x7d   :  { %399 = vst [vmem:[#allocation10 + $0xaa0] sm:$0xff] %v762_v1  ;;  %401 = vst [vmem:[#allocation10 + $0xab0] sm:$0xff] %v762_v1 }
  0x7e   :  { %403 = vst [vmem:[#allocation10 + $0xac0] sm:$0xff] %v762_v1  ;;  %405 = vst [vmem:[#allocation10 + $0xad0] sm:$0xff] %v762_v1 }
  0x7f   :  { %407 = vst [vmem:[#allocation10 + $0xae0] sm:$0xff] %v762_v1  ;;  %409 = vst [vmem:[#allocation10 + $0xaf0] sm:$0xff] %v762_v1 }
  0x80   :  { %411 = vst [vmem:[#allocation10 + $0xb00] sm:$0xff] %v762_v1  ;;  %413 = vst [vmem:[#allocation10 + $0xb10] sm:$0xff] %v762_v1 }
  0x81   :  { %415 = vst [vmem:[#allocation10 + $0xb20] sm:$0xff] %v762_v1  ;;  %417 = vst [vmem:[#allocation10 + $0xb30] sm:$0xff] %v762_v1 }
  0x82   :  { %419 = vst [vmem:[#allocation10 + $0xb40] sm:$0xff] %v762_v1  ;;  %421 = vst [vmem:[#allocation10 + $0xb50] sm:$0xff] %v762_v1 }
  0x83   :  { %423 = vst [vmem:[#allocation10 + $0xb60] sm:$0xff] %v762_v1  ;;  %425 = vst [vmem:[#allocation10 + $0xb70] sm:$0xff] %v762_v1 }
  0x84   :  { %427 = vst [vmem:[#allocation10 + $0xb80] sm:$0xff] %v762_v1  ;;  %429 = vst [vmem:[#allocation10 + $0xb90] sm:$0xff] %v762_v1 }
  0x85   :  { %431 = vst [vmem:[#allocation10 + $0xba0] sm:$0xff] %v762_v1  ;;  %433 = vst [vmem:[#allocation10 + $0xbb0] sm:$0xff] %v762_v1 }
  0x86   :  { %435 = vst [vmem:[#allocation10 + $0xbc0] sm:$0xff] %v762_v1  ;;  %437 = vst [vmem:[#allocation10 + $0xbd0] sm:$0xff] %v762_v1 }
  0x87   :  { %439 = vst [vmem:[#allocation10 + $0xbe0] sm:$0xff] %v762_v1  ;;  %441 = vst [vmem:[#allocation10 + $0xbf0] sm:$0xff] %v762_v1 }
  0x88   :  { %443 = vst [vmem:[#allocation10 + $0xc00] sm:$0xff] %v762_v1  ;;  %445 = vst [vmem:[#allocation10 + $0xc10] sm:$0xff] %v762_v1 }
  0x89   :  { %447 = vst [vmem:[#allocation10 + $0xc20] sm:$0xff] %v762_v1  ;;  %449 = vst [vmem:[#allocation10 + $0xc30] sm:$0xff] %v762_v1 }
  0x8a   :  { %451 = vst [vmem:[#allocation10 + $0xc40] sm:$0xff] %v762_v1  ;;  %453 = vst [vmem:[#allocation10 + $0xc50] sm:$0xff] %v762_v1 }
  0x8b   :  { %455 = vst [vmem:[#allocation10 + $0xc60] sm:$0xff] %v762_v1  ;;  %457 = vst [vmem:[#allocation10 + $0xc70] sm:$0xff] %v762_v1 }
  0x8c   :  { %459 = vst [vmem:[#allocation10 + $0xc80] sm:$0xff] %v762_v1  ;;  %461 = vst [vmem:[#allocation10 + $0xc90] sm:$0xff] %v762_v1 }
  0x8d   :  { %463 = vst [vmem:[#allocation10 + $0xca0] sm:$0xff] %v762_v1  ;;  %465 = vst [vmem:[#allocation10 + $0xcb0] sm:$0xff] %v762_v1 }
  0x8e   :  { %467 = vst [vmem:[#allocation10 + $0xcc0] sm:$0xff] %v762_v1  ;;  %469 = vst [vmem:[#allocation10 + $0xcd0] sm:$0xff] %v762_v1 }
  0x8f   :  { %471 = vst [vmem:[#allocation10 + $0xce0] sm:$0xff] %v762_v1  ;;  %473 = vst [vmem:[#allocation10 + $0xcf0] sm:$0xff] %v762_v1 }
  0x90   :  { %475 = vst [vmem:[#allocation10 + $0xd00] sm:$0xff] %v762_v1  ;;  %477 = vst [vmem:[#allocation10 + $0xd10] sm:$0xff] %v762_v1 }
  0x91   :  { %479 = vst [vmem:[#allocation10 + $0xd20] sm:$0xff] %v762_v1  ;;  %481 = vst [vmem:[#allocation10 + $0xd30] sm:$0xff] %v762_v1 }
  0x92   :  { %483 = vst [vmem:[#allocation10 + $0xd40] sm:$0xff] %v762_v1  ;;  %485 = vst [vmem:[#allocation10 + $0xd50] sm:$0xff] %v762_v1 }
  0x93   :  { %487 = vst [vmem:[#allocation10 + $0xd60] sm:$0xff] %v762_v1  ;;  %489 = vst [vmem:[#allocation10 + $0xd70] sm:$0xff] %v762_v1 }
  0x94   :  { %491 = vst [vmem:[#allocation10 + $0xd80] sm:$0xff] %v762_v1  ;;  %493 = vst [vmem:[#allocation10 + $0xd90] sm:$0xff] %v762_v1 }
  0x95   :  { %495 = vst [vmem:[#allocation10 + $0xda0] sm:$0xff] %v762_v1  ;;  %497 = vst [vmem:[#allocation10 + $0xdb0] sm:$0xff] %v762_v1 }
  0x96   :  { %499 = vst [vmem:[#allocation10 + $0xdc0] sm:$0xff] %v762_v1  ;;  %501 = vst [vmem:[#allocation10 + $0xdd0] sm:$0xff] %v762_v1 }
  0x97   :  { %503 = vst [vmem:[#allocation10 + $0xde0] sm:$0xff] %v762_v1  ;;  %505 = vst [vmem:[#allocation10 + $0xdf0] sm:$0xff] %v762_v1 }
  0x98   :  { %507 = vst [vmem:[#allocation10 + $0xe00] sm:$0xff] %v762_v1  ;;  %509 = vst [vmem:[#allocation10 + $0xe10] sm:$0xff] %v762_v1 }
  0x99   :  { %511 = vst [vmem:[#allocation10 + $0xe20] sm:$0xff] %v762_v1  ;;  %513 = vst [vmem:[#allocation10 + $0xe30] sm:$0xff] %v762_v1 }
  0x9a   :  { %515 = vst [vmem:[#allocation10 + $0xe40] sm:$0xff] %v762_v1  ;;  %517 = vst [vmem:[#allocation10 + $0xe50] sm:$0xff] %v762_v1 }
  0x9b   :  { %519 = vst [vmem:[#allocation10 + $0xe60] sm:$0xff] %v762_v1  ;;  %521 = vst [vmem:[#allocation10 + $0xe70] sm:$0xff] %v762_v1 }
  0x9c   :  { %523 = vst [vmem:[#allocation10 + $0xe80] sm:$0xff] %v762_v1  ;;  %525 = vst [vmem:[#allocation10 + $0xe90] sm:$0xff] %v762_v1 }
  0x9d   :  { %527 = vst [vmem:[#allocation10 + $0xea0] sm:$0xff] %v762_v1  ;;  %529 = vst [vmem:[#allocation10 + $0xeb0] sm:$0xff] %v762_v1 }
  0x9e   :  { %531 = vst [vmem:[#allocation10 + $0xec0] sm:$0xff] %v762_v1  ;;  %533 = vst [vmem:[#allocation10 + $0xed0] sm:$0xff] %v762_v1 }
  0x9f   :  { %535 = vst [vmem:[#allocation10 + $0xee0] sm:$0xff] %v762_v1  ;;  %537 = vst [vmem:[#allocation10 + $0xef0] sm:$0xff] %v762_v1 }
  0xa0   :  { %539 = vst [vmem:[#allocation10 + $0xf00] sm:$0xff] %v762_v1  ;;  %541 = vst [vmem:[#allocation10 + $0xf10] sm:$0xff] %v762_v1 }
  0xa1   :  { %543 = vst [vmem:[#allocation10 + $0xf20] sm:$0xff] %v762_v1  ;;  %545 = vst [vmem:[#allocation10 + $0xf30] sm:$0xff] %v762_v1 }
  0xa2   :  { %547 = vst [vmem:[#allocation10 + $0xf40] sm:$0xff] %v762_v1  ;;  %549 = vst [vmem:[#allocation10 + $0xf50] sm:$0xff] %v762_v1 }
  0xa3   :  { %551 = vst [vmem:[#allocation10 + $0xf60] sm:$0xff] %v762_v1  ;;  %553 = vst [vmem:[#allocation10 + $0xf70] sm:$0xff] %v762_v1 }
  0xa4   :  { %555 = vst [vmem:[#allocation10 + $0xf80] sm:$0xff] %v762_v1  ;;  %557 = vst [vmem:[#allocation10 + $0xf90] sm:$0xff] %v762_v1 }
  0xa5   :  { %60 = vst.msk [vmem:[#allocation10 + $0x8] sm:$0xff] %vm59_vm0, %v762_v1  ;;  %62 = vst.msk [vmem:[#allocation10 + $0x18] sm:$0xff] %vm59_vm0, %v762_v1 }
  0xa6   :  { %64 = vst.msk [vmem:[#allocation10 + $0x28] sm:$0xff] %vm59_vm0, %v762_v1  ;;  %66 = vst.msk [vmem:[#allocation10 + $0x38] sm:$0xff] %vm59_vm0, %v762_v1 }
  0xa7   :  { %68 = vst.msk [vmem:[#allocation10 + $0x48] sm:$0xff] %vm59_vm0, %v762_v1  ;;  %70 = vst.msk [vmem:[#allocation10 + $0x58] sm:$0xff] %vm59_vm0, %v762_v1 }
  0xa8   :  { %72 = vst.msk [vmem:[#allocation10 + $0x68] sm:$0xff] %vm59_vm0, %v762_v1  ;;  %74 = vst.msk [vmem:[#allocation10 + $0x78] sm:$0xff] %vm59_vm0, %v762_v1 }
  0xa9   :  { %76 = vst.msk [vmem:[#allocation10 + $0x88] sm:$0xff] %vm59_vm0, %v762_v1  ;;  %78 = vst.msk [vmem:[#allocation10 + $0x98] sm:$0xff] %vm59_vm0, %v762_v1 }
  0xaa   :  { %80 = vst.msk [vmem:[#allocation10 + $0xa8] sm:$0xff] %vm59_vm0, %v762_v1  ;;  %82 = vst.msk [vmem:[#allocation10 + $0xb8] sm:$0xff] %vm59_vm0, %v762_v1 }
  0xab   :  { %84 = vst.msk [vmem:[#allocation10 + $0xc8] sm:$0xff] %vm59_vm0, %v762_v1  ;;  %86 = vst.msk [vmem:[#allocation10 + $0xd8] sm:$0xff] %vm59_vm0, %v762_v1 }
  0xac   :  { %88 = vst.msk [vmem:[#allocation10 + $0xe8] sm:$0xff] %vm59_vm0, %v762_v1  ;;  %90 = vst.msk [vmem:[#allocation10 + $0xf8] sm:$0xff] %vm59_vm0, %v762_v1 }
  0xad   :  { %92 = vst.msk [vmem:[#allocation10 + $0x108] sm:$0xff] %vm59_vm0, %v762_v1  ;;  %94 = vst.msk [vmem:[#allocation10 + $0x118] sm:$0xff] %vm59_vm0, %v762_v1 }
  0xae   :  { %96 = vst.msk [vmem:[#allocation10 + $0x128] sm:$0xff] %vm59_vm0, %v762_v1  ;;  %98 = vst.msk [vmem:[#allocation10 + $0x138] sm:$0xff] %vm59_vm0, %v762_v1 }
  0xaf   :  { %100 = vst.msk [vmem:[#allocation10 + $0x148] sm:$0xff] %vm59_vm0, %v762_v1  ;;  %102 = vst.msk [vmem:[#allocation10 + $0x158] sm:$0xff] %vm59_vm0, %v762_v1 }
  0xb0   :  { %104 = vst.msk [vmem:[#allocation10 + $0x168] sm:$0xff] %vm59_vm0, %v762_v1  ;;  %106 = vst.msk [vmem:[#allocation10 + $0x178] sm:$0xff] %vm59_vm0, %v762_v1 }
  0xb1   :  { %108 = vst.msk [vmem:[#allocation10 + $0x188] sm:$0xff] %vm59_vm0, %v762_v1  ;;  %110 = vst.msk [vmem:[#allocation10 + $0x198] sm:$0xff] %vm59_vm0, %v762_v1 }
  0xb2   :  { %112 = vst.msk [vmem:[#allocation10 + $0x1a8] sm:$0xff] %vm59_vm0, %v762_v1  ;;  %114 = vst.msk [vmem:[#allocation10 + $0x1b8] sm:$0xff] %vm59_vm0, %v762_v1 }
  0xb3   :  { %116 = vst.msk [vmem:[#allocation10 + $0x1c8] sm:$0xff] %vm59_vm0, %v762_v1  ;;  %118 = vst.msk [vmem:[#allocation10 + $0x1d8] sm:$0xff] %vm59_vm0, %v762_v1 }
  0xb4   :  { %120 = vst.msk [vmem:[#allocation10 + $0x1e8] sm:$0xff] %vm59_vm0, %v762_v1  ;;  %122 = vst.msk [vmem:[#allocation10 + $0x1f8] sm:$0xff] %vm59_vm0, %v762_v1 }
  0xb5   :  { %124 = vst.msk [vmem:[#allocation10 + $0x208] sm:$0xff] %vm59_vm0, %v762_v1  ;;  %126 = vst.msk [vmem:[#allocation10 + $0x218] sm:$0xff] %vm59_vm0, %v762_v1 }
  0xb6   :  { %128 = vst.msk [vmem:[#allocation10 + $0x228] sm:$0xff] %vm59_vm0, %v762_v1  ;;  %130 = vst.msk [vmem:[#allocation10 + $0x238] sm:$0xff] %vm59_vm0, %v762_v1 }
  0xb7   :  { %132 = vst.msk [vmem:[#allocation10 + $0x248] sm:$0xff] %vm59_vm0, %v762_v1  ;;  %134 = vst.msk [vmem:[#allocation10 + $0x258] sm:$0xff] %vm59_vm0, %v762_v1 }
  0xb8   :  { %136 = vst.msk [vmem:[#allocation10 + $0x268] sm:$0xff] %vm59_vm0, %v762_v1  ;;  %138 = vst.msk [vmem:[#allocation10 + $0x278] sm:$0xff] %vm59_vm0, %v762_v1 }
  0xb9   :  { %140 = vst.msk [vmem:[#allocation10 + $0x288] sm:$0xff] %vm59_vm0, %v762_v1  ;;  %142 = vst.msk [vmem:[#allocation10 + $0x298] sm:$0xff] %vm59_vm0, %v762_v1 }
  0xba   :  { %144 = vst.msk [vmem:[#allocation10 + $0x2a8] sm:$0xff] %vm59_vm0, %v762_v1  ;;  %146 = vst.msk [vmem:[#allocation10 + $0x2b8] sm:$0xff] %vm59_vm0, %v762_v1 }
  0xbb   :  { %148 = vst.msk [vmem:[#allocation10 + $0x2c8] sm:$0xff] %vm59_vm0, %v762_v1  ;;  %150 = vst.msk [vmem:[#allocation10 + $0x2d8] sm:$0xff] %vm59_vm0, %v762_v1 }
  0xbc   :  { %152 = vst.msk [vmem:[#allocation10 + $0x2e8] sm:$0xff] %vm59_vm0, %v762_v1  ;;  %154 = vst.msk [vmem:[#allocation10 + $0x2f8] sm:$0xff] %vm59_vm0, %v762_v1 }
  0xbd   :  { %156 = vst.msk [vmem:[#allocation10 + $0x308] sm:$0xff] %vm59_vm0, %v762_v1  ;;  %158 = vst.msk [vmem:[#allocation10 + $0x318] sm:$0xff] %vm59_vm0, %v762_v1 }
  0xbe   :  { %160 = vst.msk [vmem:[#allocation10 + $0x328] sm:$0xff] %vm59_vm0, %v762_v1  ;;  %162 = vst.msk [vmem:[#allocation10 + $0x338] sm:$0xff] %vm59_vm0, %v762_v1 }
  0xbf   :  { %164 = vst.msk [vmem:[#allocation10 + $0x348] sm:$0xff] %vm59_vm0, %v762_v1  ;;  %166 = vst.msk [vmem:[#allocation10 + $0x358] sm:$0xff] %vm59_vm0, %v762_v1 }
  0xc0   :  { %168 = vst.msk [vmem:[#allocation10 + $0x368] sm:$0xff] %vm59_vm0, %v762_v1  ;;  %170 = vst.msk [vmem:[#allocation10 + $0x378] sm:$0xff] %vm59_vm0, %v762_v1 }
  0xc1   :  { %172 = vst.msk [vmem:[#allocation10 + $0x388] sm:$0xff] %vm59_vm0, %v762_v1  ;;  %174 = vst.msk [vmem:[#allocation10 + $0x398] sm:$0xff] %vm59_vm0, %v762_v1 }
  0xc2   :  { %176 = vst.msk [vmem:[#allocation10 + $0x3a8] sm:$0xff] %vm59_vm0, %v762_v1  ;;  %178 = vst.msk [vmem:[#allocation10 + $0x3b8] sm:$0xff] %vm59_vm0, %v762_v1 }
  0xc3   :  { %180 = vst.msk [vmem:[#allocation10 + $0x3c8] sm:$0xff] %vm59_vm0, %v762_v1  ;;  %182 = vst.msk [vmem:[#allocation10 + $0x3d8] sm:$0xff] %vm59_vm0, %v762_v1 }
  0xc4   :  { %184 = vst.msk [vmem:[#allocation10 + $0x3e8] sm:$0xff] %vm59_vm0, %v762_v1  ;;  %186 = vst.msk [vmem:[#allocation10 + $0x3f8] sm:$0xff] %vm59_vm0, %v762_v1 }
  0xc5   :  { %188 = vst.msk [vmem:[#allocation10 + $0x408] sm:$0xff] %vm59_vm0, %v762_v1  ;;  %190 = vst.msk [vmem:[#allocation10 + $0x418] sm:$0xff] %vm59_vm0, %v762_v1 }
  0xc6   :  { %192 = vst.msk [vmem:[#allocation10 + $0x428] sm:$0xff] %vm59_vm0, %v762_v1  ;;  %194 = vst.msk [vmem:[#allocation10 + $0x438] sm:$0xff] %vm59_vm0, %v762_v1 }
  0xc7   :  { %196 = vst.msk [vmem:[#allocation10 + $0x448] sm:$0xff] %vm59_vm0, %v762_v1  ;;  %198 = vst.msk [vmem:[#allocation10 + $0x458] sm:$0xff] %vm59_vm0, %v762_v1 }
  0xc8   :  { %200 = vst.msk [vmem:[#allocation10 + $0x468] sm:$0xff] %vm59_vm0, %v762_v1  ;;  %202 = vst.msk [vmem:[#allocation10 + $0x478] sm:$0xff] %vm59_vm0, %v762_v1 }
  0xc9   :  { %204 = vst.msk [vmem:[#allocation10 + $0x488] sm:$0xff] %vm59_vm0, %v762_v1  ;;  %206 = vst.msk [vmem:[#allocation10 + $0x498] sm:$0xff] %vm59_vm0, %v762_v1 }
  0xca   :  { %208 = vst.msk [vmem:[#allocation10 + $0x4a8] sm:$0xff] %vm59_vm0, %v762_v1  ;;  %210 = vst.msk [vmem:[#allocation10 + $0x4b8] sm:$0xff] %vm59_vm0, %v762_v1 }
  0xcb   :  { %212 = vst.msk [vmem:[#allocation10 + $0x4c8] sm:$0xff] %vm59_vm0, %v762_v1  ;;  %214 = vst.msk [vmem:[#allocation10 + $0x4d8] sm:$0xff] %vm59_vm0, %v762_v1 }
  0xcc   :  { %216 = vst.msk [vmem:[#allocation10 + $0x4e8] sm:$0xff] %vm59_vm0, %v762_v1  ;;  %218 = vst.msk [vmem:[#allocation10 + $0x4f8] sm:$0xff] %vm59_vm0, %v762_v1 }
  0xcd   :  { %220 = vst.msk [vmem:[#allocation10 + $0x508] sm:$0xff] %vm59_vm0, %v762_v1  ;;  %222 = vst.msk [vmem:[#allocation10 + $0x518] sm:$0xff] %vm59_vm0, %v762_v1 }
  0xce   :  { %224 = vst.msk [vmem:[#allocation10 + $0x528] sm:$0xff] %vm59_vm0, %v762_v1  ;;  %226 = vst.msk [vmem:[#allocation10 + $0x538] sm:$0xff] %vm59_vm0, %v762_v1 }
  0xcf   :  { %228 = vst.msk [vmem:[#allocation10 + $0x548] sm:$0xff] %vm59_vm0, %v762_v1  ;;  %230 = vst.msk [vmem:[#allocation10 + $0x558] sm:$0xff] %vm59_vm0, %v762_v1 }
  0xd0   :  { %232 = vst.msk [vmem:[#allocation10 + $0x568] sm:$0xff] %vm59_vm0, %v762_v1  ;;  %234 = vst.msk [vmem:[#allocation10 + $0x578] sm:$0xff] %vm59_vm0, %v762_v1 }
  0xd1   :  { %236 = vst.msk [vmem:[#allocation10 + $0x588] sm:$0xff] %vm59_vm0, %v762_v1  ;;  %238 = vst.msk [vmem:[#allocation10 + $0x598] sm:$0xff] %vm59_vm0, %v762_v1 }
  0xd2   :  { %240 = vst.msk [vmem:[#allocation10 + $0x5a8] sm:$0xff] %vm59_vm0, %v762_v1  ;;  %242 = vst.msk [vmem:[#allocation10 + $0x5b8] sm:$0xff] %vm59_vm0, %v762_v1 }
  0xd3   :  { %244 = vst.msk [vmem:[#allocation10 + $0x5c8] sm:$0xff] %vm59_vm0, %v762_v1  ;;  %246 = vst.msk [vmem:[#allocation10 + $0x5d8] sm:$0xff] %vm59_vm0, %v762_v1 }
  0xd4   :  { %248 = vst.msk [vmem:[#allocation10 + $0x5e8] sm:$0xff] %vm59_vm0, %v762_v1  ;;  %250 = vst.msk [vmem:[#allocation10 + $0x5f8] sm:$0xff] %vm59_vm0, %v762_v1 }
  0xd5   :  { %252 = vst.msk [vmem:[#allocation10 + $0x608] sm:$0xff] %vm59_vm0, %v762_v1  ;;  %254 = vst.msk [vmem:[#allocation10 + $0x618] sm:$0xff] %vm59_vm0, %v762_v1 }
  0xd6   :  { %256 = vst.msk [vmem:[#allocation10 + $0x628] sm:$0xff] %vm59_vm0, %v762_v1  ;;  %258 = vst.msk [vmem:[#allocation10 + $0x638] sm:$0xff] %vm59_vm0, %v762_v1 }
  0xd7   :  { %260 = vst.msk [vmem:[#allocation10 + $0x648] sm:$0xff] %vm59_vm0, %v762_v1  ;;  %262 = vst.msk [vmem:[#allocation10 + $0x658] sm:$0xff] %vm59_vm0, %v762_v1 }
  0xd8   :  { %264 = vst.msk [vmem:[#allocation10 + $0x668] sm:$0xff] %vm59_vm0, %v762_v1  ;;  %266 = vst.msk [vmem:[#allocation10 + $0x678] sm:$0xff] %vm59_vm0, %v762_v1 }
  0xd9   :  { %268 = vst.msk [vmem:[#allocation10 + $0x688] sm:$0xff] %vm59_vm0, %v762_v1  ;;  %270 = vst.msk [vmem:[#allocation10 + $0x698] sm:$0xff] %vm59_vm0, %v762_v1 }
  0xda   :  { %272 = vst.msk [vmem:[#allocation10 + $0x6a8] sm:$0xff] %vm59_vm0, %v762_v1  ;;  %274 = vst.msk [vmem:[#allocation10 + $0x6b8] sm:$0xff] %vm59_vm0, %v762_v1 }
  0xdb   :  { %276 = vst.msk [vmem:[#allocation10 + $0x6c8] sm:$0xff] %vm59_vm0, %v762_v1  ;;  %278 = vst.msk [vmem:[#allocation10 + $0x6d8] sm:$0xff] %vm59_vm0, %v762_v1 }
  0xdc   :  { %280 = vst.msk [vmem:[#allocation10 + $0x6e8] sm:$0xff] %vm59_vm0, %v762_v1  ;;  %282 = vst.msk [vmem:[#allocation10 + $0x6f8] sm:$0xff] %vm59_vm0, %v762_v1 }
  0xdd   :  { %284 = vst.msk [vmem:[#allocation10 + $0x708] sm:$0xff] %vm59_vm0, %v762_v1  ;;  %286 = vst.msk [vmem:[#allocation10 + $0x718] sm:$0xff] %vm59_vm0, %v762_v1 }
  0xde   :  { %288 = vst.msk [vmem:[#allocation10 + $0x728] sm:$0xff] %vm59_vm0, %v762_v1  ;;  %290 = vst.msk [vmem:[#allocation10 + $0x738] sm:$0xff] %vm59_vm0, %v762_v1 }
  0xdf   :  { %292 = vst.msk [vmem:[#allocation10 + $0x748] sm:$0xff] %vm59_vm0, %v762_v1  ;;  %294 = vst.msk [vmem:[#allocation10 + $0x758] sm:$0xff] %vm59_vm0, %v762_v1 }
  0xe0   :  { %296 = vst.msk [vmem:[#allocation10 + $0x768] sm:$0xff] %vm59_vm0, %v762_v1  ;;  %298 = vst.msk [vmem:[#allocation10 + $0x778] sm:$0xff] %vm59_vm0, %v762_v1 }
  0xe1   :  { %300 = vst.msk [vmem:[#allocation10 + $0x788] sm:$0xff] %vm59_vm0, %v762_v1  ;;  %302 = vst.msk [vmem:[#allocation10 + $0x798] sm:$0xff] %vm59_vm0, %v762_v1 }
  0xe2   :  { %304 = vst.msk [vmem:[#allocation10 + $0x7a8] sm:$0xff] %vm59_vm0, %v762_v1  ;;  %306 = vst.msk [vmem:[#allocation10 + $0x7b8] sm:$0xff] %vm59_vm0, %v762_v1 }
  0xe3   :  { %308 = vst.msk [vmem:[#allocation10 + $0x7c8] sm:$0xff] %vm59_vm0, %v762_v1  ;;  %310 = vst.msk [vmem:[#allocation10 + $0x7d8] sm:$0xff] %vm59_vm0, %v762_v1 }
  0xe4   :  { %312 = vst.msk [vmem:[#allocation10 + $0x7e8] sm:$0xff] %vm59_vm0, %v762_v1  ;;  %314 = vst.msk [vmem:[#allocation10 + $0x7f8] sm:$0xff] %vm59_vm0, %v762_v1 }
  0xe5   :  { %316 = vst.msk [vmem:[#allocation10 + $0x808] sm:$0xff] %vm59_vm0, %v762_v1  ;;  %318 = vst.msk [vmem:[#allocation10 + $0x818] sm:$0xff] %vm59_vm0, %v762_v1 }
  0xe6   :  { %320 = vst.msk [vmem:[#allocation10 + $0x828] sm:$0xff] %vm59_vm0, %v762_v1  ;;  %322 = vst.msk [vmem:[#allocation10 + $0x838] sm:$0xff] %vm59_vm0, %v762_v1 }
  0xe7   :  { %324 = vst.msk [vmem:[#allocation10 + $0x848] sm:$0xff] %vm59_vm0, %v762_v1  ;;  %326 = vst.msk [vmem:[#allocation10 + $0x858] sm:$0xff] %vm59_vm0, %v762_v1 }
  0xe8   :  { %328 = vst.msk [vmem:[#allocation10 + $0x868] sm:$0xff] %vm59_vm0, %v762_v1  ;;  %330 = vst.msk [vmem:[#allocation10 + $0x878] sm:$0xff] %vm59_vm0, %v762_v1 }
  0xe9   :  { %332 = vst.msk [vmem:[#allocation10 + $0x888] sm:$0xff] %vm59_vm0, %v762_v1  ;;  %334 = vst.msk [vmem:[#allocation10 + $0x898] sm:$0xff] %vm59_vm0, %v762_v1 }
  0xea   :  { %336 = vst.msk [vmem:[#allocation10 + $0x8a8] sm:$0xff] %vm59_vm0, %v762_v1  ;;  %338 = vst.msk [vmem:[#allocation10 + $0x8b8] sm:$0xff] %vm59_vm0, %v762_v1 }
  0xeb   :  { %340 = vst.msk [vmem:[#allocation10 + $0x8c8] sm:$0xff] %vm59_vm0, %v762_v1  ;;  %342 = vst.msk [vmem:[#allocation10 + $0x8d8] sm:$0xff] %vm59_vm0, %v762_v1 }
  0xec   :  { %344 = vst.msk [vmem:[#allocation10 + $0x8e8] sm:$0xff] %vm59_vm0, %v762_v1  ;;  %346 = vst.msk [vmem:[#allocation10 + $0x8f8] sm:$0xff] %vm59_vm0, %v762_v1 }
  0xed   :  { %348 = vst.msk [vmem:[#allocation10 + $0x908] sm:$0xff] %vm59_vm0, %v762_v1  ;;  %350 = vst.msk [vmem:[#allocation10 + $0x918] sm:$0xff] %vm59_vm0, %v762_v1 }
  0xee   :  { %352 = vst.msk [vmem:[#allocation10 + $0x928] sm:$0xff] %vm59_vm0, %v762_v1  ;;  %354 = vst.msk [vmem:[#allocation10 + $0x938] sm:$0xff] %vm59_vm0, %v762_v1 }
  0xef   :  { %356 = vst.msk [vmem:[#allocation10 + $0x948] sm:$0xff] %vm59_vm0, %v762_v1  ;;  %358 = vst.msk [vmem:[#allocation10 + $0x958] sm:$0xff] %vm59_vm0, %v762_v1 }
  0xf0   :  { %360 = vst.msk [vmem:[#allocation10 + $0x968] sm:$0xff] %vm59_vm0, %v762_v1  ;;  %362 = vst.msk [vmem:[#allocation10 + $0x978] sm:$0xff] %vm59_vm0, %v762_v1 }
  0xf1   :  { %364 = vst.msk [vmem:[#allocation10 + $0x988] sm:$0xff] %vm59_vm0, %v762_v1  ;;  %366 = vst.msk [vmem:[#allocation10 + $0x998] sm:$0xff] %vm59_vm0, %v762_v1 }
  0xf2   :  { %368 = vst.msk [vmem:[#allocation10 + $0x9a8] sm:$0xff] %vm59_vm0, %v762_v1  ;;  %370 = vst.msk [vmem:[#allocation10 + $0x9b8] sm:$0xff] %vm59_vm0, %v762_v1 }
  0xf3   :  { %372 = vst.msk [vmem:[#allocation10 + $0x9c8] sm:$0xff] %vm59_vm0, %v762_v1  ;;  %374 = vst.msk [vmem:[#allocation10 + $0x9d8] sm:$0xff] %vm59_vm0, %v762_v1 }
  0xf4   :  { %376 = vst.msk [vmem:[#allocation10 + $0x9e8] sm:$0xff] %vm59_vm0, %v762_v1  ;;  %378 = vst.msk [vmem:[#allocation10 + $0x9f8] sm:$0xff] %vm59_vm0, %v762_v1 }
  0xf5   :  { %380 = vst.msk [vmem:[#allocation10 + $0xa08] sm:$0xff] %vm59_vm0, %v762_v1  ;;  %382 = vst.msk [vmem:[#allocation10 + $0xa18] sm:$0xff] %vm59_vm0, %v762_v1 }
  0xf6   :  { %384 = vst.msk [vmem:[#allocation10 + $0xa28] sm:$0xff] %vm59_vm0, %v762_v1  ;;  %386 = vst.msk [vmem:[#allocation10 + $0xa38] sm:$0xff] %vm59_vm0, %v762_v1 }
  0xf7   :  { %388 = vst.msk [vmem:[#allocation10 + $0xa48] sm:$0xff] %vm59_vm0, %v762_v1  ;;  %390 = vst.msk [vmem:[#allocation10 + $0xa58] sm:$0xff] %vm59_vm0, %v762_v1 }
  0xf8   :  { %392 = vst.msk [vmem:[#allocation10 + $0xa68] sm:$0xff] %vm59_vm0, %v762_v1  ;;  %394 = vst.msk [vmem:[#allocation10 + $0xa78] sm:$0xff] %vm59_vm0, %v762_v1 }
  0xf9   :  { %396 = vst.msk [vmem:[#allocation10 + $0xa88] sm:$0xff] %vm59_vm0, %v762_v1  ;;  %398 = vst.msk [vmem:[#allocation10 + $0xa98] sm:$0xff] %vm59_vm0, %v762_v1 }
  0xfa   :  { %400 = vst.msk [vmem:[#allocation10 + $0xaa8] sm:$0xff] %vm59_vm0, %v762_v1  ;;  %402 = vst.msk [vmem:[#allocation10 + $0xab8] sm:$0xff] %vm59_vm0, %v762_v1 }
  0xfb   :  { %404 = vst.msk [vmem:[#allocation10 + $0xac8] sm:$0xff] %vm59_vm0, %v762_v1  ;;  %406 = vst.msk [vmem:[#allocation10 + $0xad8] sm:$0xff] %vm59_vm0, %v762_v1 }
  0xfc   :  { %408 = vst.msk [vmem:[#allocation10 + $0xae8] sm:$0xff] %vm59_vm0, %v762_v1  ;;  %410 = vst.msk [vmem:[#allocation10 + $0xaf8] sm:$0xff] %vm59_vm0, %v762_v1 }
  0xfd   :  { %412 = vst.msk [vmem:[#allocation10 + $0xb08] sm:$0xff] %vm59_vm0, %v762_v1  ;;  %414 = vst.msk [vmem:[#allocation10 + $0xb18] sm:$0xff] %vm59_vm0, %v762_v1 }
  0xfe   :  { %416 = vst.msk [vmem:[#allocation10 + $0xb28] sm:$0xff] %vm59_vm0, %v762_v1  ;;  %418 = vst.msk [vmem:[#allocation10 + $0xb38] sm:$0xff] %vm59_vm0, %v762_v1 }
  0xff   :  { %420 = vst.msk [vmem:[#allocation10 + $0xb48] sm:$0xff] %vm59_vm0, %v762_v1  ;;  %422 = vst.msk [vmem:[#allocation10 + $0xb58] sm:$0xff] %vm59_vm0, %v762_v1 }
 0x100   :  { %424 = vst.msk [vmem:[#allocation10 + $0xb68] sm:$0xff] %vm59_vm0, %v762_v1  ;;  %426 = vst.msk [vmem:[#allocation10 + $0xb78] sm:$0xff] %vm59_vm0, %v762_v1 }
 0x101   :  { %428 = vst.msk [vmem:[#allocation10 + $0xb88] sm:$0xff] %vm59_vm0, %v762_v1  ;;  %430 = vst.msk [vmem:[#allocation10 + $0xb98] sm:$0xff] %vm59_vm0, %v762_v1 }
 0x102   :  { %432 = vst.msk [vmem:[#allocation10 + $0xba8] sm:$0xff] %vm59_vm0, %v762_v1  ;;  %434 = vst.msk [vmem:[#allocation10 + $0xbb8] sm:$0xff] %vm59_vm0, %v762_v1 }
 0x103   :  { %436 = vst.msk [vmem:[#allocation10 + $0xbc8] sm:$0xff] %vm59_vm0, %v762_v1  ;;  %438 = vst.msk [vmem:[#allocation10 + $0xbd8] sm:$0xff] %vm59_vm0, %v762_v1 }
 0x104   :  { %440 = vst.msk [vmem:[#allocation10 + $0xbe8] sm:$0xff] %vm59_vm0, %v762_v1  ;;  %442 = vst.msk [vmem:[#allocation10 + $0xbf8] sm:$0xff] %vm59_vm0, %v762_v1 }
 0x105   :  { %444 = vst.msk [vmem:[#allocation10 + $0xc08] sm:$0xff] %vm59_vm0, %v762_v1  ;;  %446 = vst.msk [vmem:[#allocation10 + $0xc18] sm:$0xff] %vm59_vm0, %v762_v1 }
 0x106   :  { %448 = vst.msk [vmem:[#allocation10 + $0xc28] sm:$0xff] %vm59_vm0, %v762_v1  ;;  %450 = vst.msk [vmem:[#allocation10 + $0xc38] sm:$0xff] %vm59_vm0, %v762_v1 }
 0x107   :  { %452 = vst.msk [vmem:[#allocation10 + $0xc48] sm:$0xff] %vm59_vm0, %v762_v1  ;;  %454 = vst.msk [vmem:[#allocation10 + $0xc58] sm:$0xff] %vm59_vm0, %v762_v1 }
 0x108   :  { %456 = vst.msk [vmem:[#allocation10 + $0xc68] sm:$0xff] %vm59_vm0, %v762_v1  ;;  %458 = vst.msk [vmem:[#allocation10 + $0xc78] sm:$0xff] %vm59_vm0, %v762_v1 }
 0x109   :  { %460 = vst.msk [vmem:[#allocation10 + $0xc88] sm:$0xff] %vm59_vm0, %v762_v1  ;;  %462 = vst.msk [vmem:[#allocation10 + $0xc98] sm:$0xff] %vm59_vm0, %v762_v1 }
 0x10a   :  { %464 = vst.msk [vmem:[#allocation10 + $0xca8] sm:$0xff] %vm59_vm0, %v762_v1  ;;  %466 = vst.msk [vmem:[#allocation10 + $0xcb8] sm:$0xff] %vm59_vm0, %v762_v1 }
 0x10b   :  { %468 = vst.msk [vmem:[#allocation10 + $0xcc8] sm:$0xff] %vm59_vm0, %v762_v1  ;;  %470 = vst.msk [vmem:[#allocation10 + $0xcd8] sm:$0xff] %vm59_vm0, %v762_v1 }
 0x10c   :  { %472 = vst.msk [vmem:[#allocation10 + $0xce8] sm:$0xff] %vm59_vm0, %v762_v1  ;;  %474 = vst.msk [vmem:[#allocation10 + $0xcf8] sm:$0xff] %vm59_vm0, %v762_v1 }
 0x10d   :  { %476 = vst.msk [vmem:[#allocation10 + $0xd08] sm:$0xff] %vm59_vm0, %v762_v1  ;;  %478 = vst.msk [vmem:[#allocation10 + $0xd18] sm:$0xff] %vm59_vm0, %v762_v1 }
 0x10e   :  { %480 = vst.msk [vmem:[#allocation10 + $0xd28] sm:$0xff] %vm59_vm0, %v762_v1  ;;  %482 = vst.msk [vmem:[#allocation10 + $0xd38] sm:$0xff] %vm59_vm0, %v762_v1 }
 0x10f   :  { %484 = vst.msk [vmem:[#allocation10 + $0xd48] sm:$0xff] %vm59_vm0, %v762_v1  ;;  %486 = vst.msk [vmem:[#allocation10 + $0xd58] sm:$0xff] %vm59_vm0, %v762_v1 }
 0x110   :  { %488 = vst.msk [vmem:[#allocation10 + $0xd68] sm:$0xff] %vm59_vm0, %v762_v1  ;;  %490 = vst.msk [vmem:[#allocation10 + $0xd78] sm:$0xff] %vm59_vm0, %v762_v1 }
 0x111   :  { %492 = vst.msk [vmem:[#allocation10 + $0xd88] sm:$0xff] %vm59_vm0, %v762_v1  ;;  %494 = vst.msk [vmem:[#allocation10 + $0xd98] sm:$0xff] %vm59_vm0, %v762_v1 }
 0x112   :  { %496 = vst.msk [vmem:[#allocation10 + $0xda8] sm:$0xff] %vm59_vm0, %v762_v1  ;;  %498 = vst.msk [vmem:[#allocation10 + $0xdb8] sm:$0xff] %vm59_vm0, %v762_v1 }
 0x113   :  { %500 = vst.msk [vmem:[#allocation10 + $0xdc8] sm:$0xff] %vm59_vm0, %v762_v1  ;;  %502 = vst.msk [vmem:[#allocation10 + $0xdd8] sm:$0xff] %vm59_vm0, %v762_v1 }
 0x114   :  { %504 = vst.msk [vmem:[#allocation10 + $0xde8] sm:$0xff] %vm59_vm0, %v762_v1  ;;  %506 = vst.msk [vmem:[#allocation10 + $0xdf8] sm:$0xff] %vm59_vm0, %v762_v1 }
 0x115   :  { %508 = vst.msk [vmem:[#allocation10 + $0xe08] sm:$0xff] %vm59_vm0, %v762_v1  ;;  %510 = vst.msk [vmem:[#allocation10 + $0xe18] sm:$0xff] %vm59_vm0, %v762_v1 }
 0x116   :  { %512 = vst.msk [vmem:[#allocation10 + $0xe28] sm:$0xff] %vm59_vm0, %v762_v1  ;;  %514 = vst.msk [vmem:[#allocation10 + $0xe38] sm:$0xff] %vm59_vm0, %v762_v1 }
 0x117   :  { %516 = vst.msk [vmem:[#allocation10 + $0xe48] sm:$0xff] %vm59_vm0, %v762_v1  ;;  %518 = vst.msk [vmem:[#allocation10 + $0xe58] sm:$0xff] %vm59_vm0, %v762_v1 }
 0x118   :  { %520 = vst.msk [vmem:[#allocation10 + $0xe68] sm:$0xff] %vm59_vm0, %v762_v1  ;;  %522 = vst.msk [vmem:[#allocation10 + $0xe78] sm:$0xff] %vm59_vm0, %v762_v1 }
 0x119   :  { %524 = vst.msk [vmem:[#allocation10 + $0xe88] sm:$0xff] %vm59_vm0, %v762_v1  ;;  %526 = vst.msk [vmem:[#allocation10 + $0xe98] sm:$0xff] %vm59_vm0, %v762_v1 }
 0x11a   :  { %528 = vst.msk [vmem:[#allocation10 + $0xea8] sm:$0xff] %vm59_vm0, %v762_v1  ;;  %530 = vst.msk [vmem:[#allocation10 + $0xeb8] sm:$0xff] %vm59_vm0, %v762_v1 }
 0x11b   :  { %532 = vst.msk [vmem:[#allocation10 + $0xec8] sm:$0xff] %vm59_vm0, %v762_v1  ;;  %534 = vst.msk [vmem:[#allocation10 + $0xed8] sm:$0xff] %vm59_vm0, %v762_v1  ;;  %656 = sbr.rel (%p655_p12) target bundleno = 313 (0x139), region = 54 }
 0x11c   :  { %536 = vst.msk [vmem:[#allocation10 + $0xee8] sm:$0xff] %vm59_vm0, %v762_v1  ;;  %538 = vst.msk [vmem:[#allocation10 + $0xef8] sm:$0xff] %vm59_vm0, %v762_v1 }
 0x11d   :  { %540 = vst.msk [vmem:[#allocation10 + $0xf08] sm:$0xff] %vm59_vm0, %v762_v1  ;;  %542 = vst.msk [vmem:[#allocation10 + $0xf18] sm:$0xff] %vm59_vm0, %v762_v1 }
 0x11e   :  { %544 = vst.msk [vmem:[#allocation10 + $0xf28] sm:$0xff] %vm59_vm0, %v762_v1  ;;  %546 = vst.msk [vmem:[#allocation10 + $0xf38] sm:$0xff] %vm59_vm0, %v762_v1 }
 0x11f   :  { %548 = vst.msk [vmem:[#allocation10 + $0xf48] sm:$0xff] %vm59_vm0, %v762_v1  ;;  %550 = vst.msk [vmem:[#allocation10 + $0xf58] sm:$0xff] %vm59_vm0, %v762_v1 }
 0x120   :  { %552 = vst.msk [vmem:[#allocation10 + $0xf68] sm:$0xff] %vm59_vm0, %v762_v1  ;;  %554 = vst.msk [vmem:[#allocation10 + $0xf78] sm:$0xff] %vm59_vm0, %v762_v1 }
 0x121   :  { %556 = vst.msk [vmem:[#allocation10 + $0xf88] sm:$0xff] %vm59_vm0, %v762_v1  ;;  %558 = vst.msk [vmem:[#allocation10 + $0xf98] sm:$0xff] %vm59_vm0, %v762_v1 }
 0x122 LB: > { %s574_s3 = sld [smem:[#allocation5 + %s756_s2]]  ;;  %v595_v4 = vshrl.u32 %v559_v0, 7  ;;  %v763_v5 = vmov 1966171168   ;;  %vm626_vm3 = vcmp.lt.s32.totalorder %v559_v0, 200  ;;  %s756_s2 = sphi %s840_s2, %s571_s2  }
 0x123   : > { %s576_s28 = sld [smem:[#allocation7 + %s756_s2]]  ;;  %v610_v6 = vunpack.c.l.s4 %v763_v5 }
 0x124   : > { %s578_s29 = sld [smem:[#allocation8 + %s756_s2]]  ;;  %v596_v8 = vsub.s32 0, %v595_v4  ;;  %v600_v9 = vsub.s32 1, %v595_v4  ;;  %s571_s2 = sadd.s32 1, %s756_s2  }
 0x125   : > { %v611_v10 = vunpack.c.0.s8 %v610_v6  ;;  %p570_p13 = scmp.ge.s32.totalorder %s571_s2, %s842_s27 }
 0x127   : > { %v614_v14 = vsub.s32 %v611_v10, %v595_v4 }
 0x128   : > { %s582_s30 = sshra.s32 %s574_s3, 3  ;;  %s585_s5 = sand.u32 7, %s574_s3 }
 0x129   : > { %s662_s6 = sshll.u32 %s582_s30, 4  ;;  %v579_v7 = vstv %s576_s28 }
 0x12a   : > { %s589_s7 = smul.u32 400, %s578_s29  ;;  %s588_s8 = sadd.s32 %s662_s6, %s585_s5  ;;  %vm580_vm1 = vcmp.eq.s32.totalorder %v560_v2, %v579_v7  ;;  %vm581_vm2 = vcmp.eq.s32.totalorder %v561_v3, %v579_v7 }
 0x12c   : > { %s590_s1 = sadd.s32 %s589_s7, %s588_s8 }
 0x12d   : > { %s591_s9 = scalar_lea.vmem [#allocation10], %s590_s1 }
 0x12e   : > { %v592_v11 = vld [vmem:[%s591_s9] ss:$8 sm:$0x3] }
 0x12f   : > { %v597_v12 = vrot.slane %v592_v11, %v596_v8  ;;  %v601_v13 = vrot.slane %v592_v11, %v600_v9 }
 0x131   : > { %v604_v15 = vsel %vm580_vm1, 1.0, %v597_v12  ;;  %v605_v16 = vsel %vm581_vm2, 1.0, %v601_v13 }
 0x132   : > { %v608_v17 = vcombine.low %v604_v15, %v605_v16  ;;  %573 = sbr.rel (!%p570_p13) target bundleno = 290 (0x122), region = 60 }
 0x134   : > { %v615_v18 = vrot.slane %v608_v17, %v614_v14 }
 0x136   : > { %v622_v19 = vrot.slane %v615_v18, %v614_v14 }
 0x138   : > { %628 = vst.msk [vmem:[%s591_s9] ss:$8 sm:$0x3] %vm626_vm3, %v622_v19 }
 0x139 PF:  { %s764_s10 = smov [#allocation10]  }
 0x13a   :  { %s635_s11 = sshll.u32 %s764_s10, 4  ;;  %s636_s11 = int_to_ptr.vmem [resolvable:$true] %s635_s11 }
 0x13b   :  { %s720_s12 = scalar_lea.vmem %s636_s11, 64000  ;;  %p725_p1 = scmp.lt.s32.totalorder %s636_s11, %s636_s11 }
 0x13c   :  { %p721_p0 = scmp.ne.s32.totalorder %s636_s11, %s720_s12  ;;  %p726_p2 = scmp.lt.s32.totalorder %s720_s12, %s720_s12 }
 0x13e   :  { %p727_p3 = por %p726_p2, %p725_p1 }
 0x140   :  { %p728_p4 = pnand %p727_p3, %p721_p0 }
 0x142   :  { %731 = shalt.err (!%p728_p4)
}
 0x143   :  { %s732_s15 = scalar_lea.hbm %s1628_s4, 64000 }
 0x144   :  { %p733_p5 = scmp.ne.s32.totalorder %s1628_s4, %s732_s15  ;;  %p736_p6 = scmp.lt.u32.totalorder %s732_s15, %s1628_s4 }
 0x146   :  { %p738_p7 = pnand %p736_p6, %p733_p5 }
 0x148   :  { %741 = shalt.err (!%p738_p7)
}
 0x149   :  { %s765_s19 = smov 256   ;;  %s766_s20 = smov 16  }
 0x14a   :  { %641 = dma.vmem_to_hbm [thread:$0]  %s636_s11, 64000, %s1628_s4, [#allocation3], %s765_s19, %s765_s19, %s766_s20  }
 0x14b   :  { %752 = dma.done.wait [#allocation3], 64000  }
 0x14c   :  { %753 = vsyncadd [#allocation3], 4294903296 }
 0x14d   :  { %645 = vsyncpa [#allocation3], 1 }
 0x14e   :  { %646 = vsyncpa [#allocation4], 1 }
 0x14f   :  { %647 = vsyncpa [#allocation6], 1 }
 0x150   :  { %648 = vsyncpa [#allocation9], 1 }

</bundles_post_ra>
